<compile_context>
chip_gen: v5e
topology: v5e:2x2
jax: 0.10.0
libtpu: 0.0.40
codegen_flags: <defaults>
</compile_context>

<pallas_src>
import functools
import numpy as np
import jax
import jax.numpy as jnp
from jax.experimental import pallas as pl
from jax.experimental.pallas import tpu as pltpu


def _round_up(v, m):
    return (v + m - 1) // m * m


def _cdiv(a, b):
    return (a + b - 1) // b


def _sublane_multiple(dtype):
    itemsize = jnp.dtype(dtype).itemsize
    return {4: 8, 2: 16, 1: 32}.get(itemsize, 8)


def _fourier_kernel(x_ref, f_ref, o_ref, *, half_pad, tb):
    # x_ref: (padded_b, 1) resident (loaded once)   f_ref: (1, half_pad) resident
    # o_ref: (tb, 2*half_pad) per-grid-step output block
    start = pl.multiple_of(pl.program_id(0) * tb, tb)
    x = x_ref[pl.ds(start, tb), :].astype(jnp.float32)      # (tb, 1)
    f = f_ref[...].astype(jnp.float32)                      # (1, half_pad), 2*pi pre-folded
    theta = x * f                                           # outer product via VPU broadcast
    o_ref[:, 0:half_pad] = jnp.cos(theta).astype(o_ref.dtype)           # lane-aligned store
    o_ref[:, half_pad:2 * half_pad] = jnp.sin(theta).astype(o_ref.dtype)  # lane-aligned store


def fourier_embedding(x, freqs, *, learnable=False, scale=None,
                      block_rows=1024, max_out_block_bytes=4 << 20):
    """Pallas TPU implementation of FourierEmbedding.forward.

    x:     (B,) noise levels.
    freqs: (C//2,) buffer. Non-learnable: already randn*scale (as registered by
           the torch module). Learnable: raw randn, and `scale` is the learnable
           scalar parameter (effective freqs = freqs * scale * 10).
    Returns (B, C) = concat([cos(2*pi*f*x), sin(2*pi*f*x)], axis=1), in x.dtype.
    """
    assert x.ndim == 1 and freqs.ndim == 1
    B = x.shape[0]
    half = freqs.shape[0]
    C = 2 * half
    out_dtype = x.dtype

    # ---- freqs prep (tiny O(C//2) one-time wrapper work, folded constants) ----
    f_eff = freqs.astype(jnp.float32)
    if learnable:
        f_eff = f_eff * (jnp.asarray(scale, jnp.float32) * 10.0)
    f_eff = (f_eff * np.float32(2.0 * np.pi)).astype(out_dtype)  # torch casts 2*pi*freqs to x.dtype

    # Lane alignment: pad the half-width to a multiple of 128 so both the cos
    # and the sin halves are full-lane, unmasked, aligned stores.
    half_pad = _round_up(half, 128)
    needs_lane_pad = half_pad != half
    if needs_lane_pad:
        f_eff = jnp.pad(f_eff, (0, half_pad - half))
    f2 = f_eff.reshape(1, half_pad)
    c_kernel = 2 * half_pad

    # ---- row-tile selection (balanced across steps, VMEM-capped) ----
    sub = max(_sublane_multiple(out_dtype), _sublane_multiple(x.dtype))
    n_steps = max(1, _cdiv(B, block_rows))
    tb = _round_up(_cdiv(B, n_steps), sub)
    out_bytes_per_row = c_kernel * jnp.dtype(out_dtype).itemsize
    max_tb = max(sub, (max_out_block_bytes // out_bytes_per_row) // sub * sub)
    tb = min(tb, max_tb)
    padded_b = _round_up(B, tb)
    grid = padded_b // tb

    xp = x if padded_b == B else jnp.pad(x, (0, padded_b - B))
    x2 = xp.reshape(padded_b, 1)

    out = pl.pallas_call(
        functools.partial(_fourier_kernel, half_pad=half_pad, tb=tb),
        out_shape=jax.ShapeDtypeStruct((padded_b, c_kernel), out_dtype),
        grid=(grid,),
        in_specs=[
            # x: full array, constant block index -> DMA'd once, resident in VMEM.
            pl.BlockSpec((padded_b, 1), lambda i: (0, 0)),
            # freqs: tiny constant row, resident in VMEM.
            pl.BlockSpec((1, half_pad), lambda i: (0, 0)),
        ],
        out_specs=pl.BlockSpec((tb, c_kernel), lambda i: (i, 0)),
        compiler_params=pltpu.CompilerParams(
            dimension_semantics=("parallel",)),
    )(x2, f2)

    out = out[:B]
    if needs_lane_pad:
        # Edge case (half % 128 != 0): reassemble the true (B, C) layout.
        out = jnp.concatenate(
            [out[:, :half], out[:, half_pad:half_pad + half]], axis=1)
    return out


def _reference(x, freqs, *, learnable=False, scale=None):
    f = freqs * (scale * 10.0) if learnable else freqs
    theta = jnp.outer(x, 2.0 * np.pi * f)
    return jnp.concatenate([jnp.cos(theta), jnp.sin(theta)], axis=1)


if __name__ == "__main__":
    key = jax.random.PRNGKey(0)
    k_f, k_x, k_f2, k_x2 = jax.random.split(key, 4)

    # --- case 1: module defaults, lane-dense fast path (C//2 = 128) ---
    batch = 2
    num_channels = 256
    scale = 16.0
    freqs = jax.random.normal(k_f, (num_channels // 2,), dtype=jnp.float32) * scale
    x = jax.random.normal(k_x, (batch,), dtype=jnp.float32)

    out = jax.block_until_ready(fourier_embedding(x, freqs))
    ref = _reference(x, freqs)
    assert out.shape == (batch, num_channels), out.shape
    assert bool(jnp.all(jnp.isfinite(out)))
    np.testing.assert_allclose(np.asarray(out), np.asarray(ref), atol=1e-5, rtol=1e-5)

    # --- case 2: learnable path + non-128-multiple half (exercises lane pad) ---
    batch2 = 77
    num_channels2 = 192          # half = 96 -> padded to 128 inside the kernel
    learn_scale = 16.0
    freqs2 = jax.random.normal(k_f2, (num_channels2 // 2,), dtype=jnp.float32)
    x2 = jax.random.normal(k_x2, (batch2,), dtype=jnp.float32)

    out2 = jax.block_until_ready(
        fourier_embedding(x2, freqs2, learnable=True, scale=learn_scale))
    ref2 = _reference(x2, freqs2, learnable=True, scale=learn_scale)
    assert out2.shape == (batch2, num_channels2), out2.shape
    np.testing.assert_allclose(np.asarray(out2), np.asarray(ref2), atol=1e-4, rtol=1e-4)

    print("KERNEL_OK")
</pallas_src>

<mosaic_0001>
module attributes {stable_mosaic.version = 11 : i64} {
  func.func @_fourier_kernel(%arg0: i32, %arg1: memref<8x1xf32, #tpu.memory_space<vmem>>, %arg2: memref<1x128xf32, #tpu.memory_space<vmem>>, %arg3: memref<8x256xf32, #tpu.memory_space<vmem>>) attributes {dimension_semantics = [#tpu.dimension_semantics<parallel>], iteration_bounds = array<i64: 1>, scalar_prefetch = 0 : i64, scratch_operands = 0 : i64, tpu.core_type = #tpu.core_type<tc>, window_params = [{pipeline_mode = #tpu.pipeline_mode<synchronous>, transform_indices = @transform_0, window_bounds = array<i64: 8, 1>}, {pipeline_mode = #tpu.pipeline_mode<synchronous>, transform_indices = @transform_1, window_bounds = array<i64: 1, 128>}, {transform_indices = @transform_2, window_bounds = array<i64: 8, 256>}]} {
    %c8_i32 = arith.constant 8 : i32
    %0 = arith.muli %arg0, %c8_i32 : i32
    %1 = tpu.assume_multiple %0, 8 : i32
    %2 = arith.index_cast %1 : i32 to index
    %c0 = arith.constant 0 : index
    %3 = vector.load %arg1[%2, %c0] : memref<8x1xf32, #tpu.memory_space<vmem>>, vector<8x1xf32>
    %c0_0 = arith.constant 0 : index
    %c0_1 = arith.constant 0 : index
    %4 = vector.load %arg2[%c0_0, %c0_1] : memref<1x128xf32, #tpu.memory_space<vmem>>, vector<1x128xf32>
    %5 = vector.broadcast %3 : vector<8x1xf32> to vector<8x128xf32>
    %6 = vector.broadcast %4 : vector<1x128xf32> to vector<8x128xf32>
    %7 = arith.mulf %5, %6 : vector<8x128xf32>
    %8 = math.cos %7 : vector<8x128xf32>
    %c0_2 = arith.constant 0 : index
    %c0_3 = arith.constant 0 : index
    %9 = vector.load %arg3[%c0_2, %c0_3] : memref<8x256xf32, #tpu.memory_space<vmem>>, vector<8x128xf32>
    tpu.vector_store %arg3[%c0_2, %c0_3], %8 {strides = array<i32>} : memref<8x256xf32, #tpu.memory_space<vmem>>, vector<8x128xf32>,
    %10 = math.sin %7 : vector<8x128xf32>
    %c0_4 = arith.constant 0 : index
    %c128 = arith.constant 128 : index
    %11 = vector.load %arg3[%c0_4, %c128] : memref<8x256xf32, #tpu.memory_space<vmem>>, vector<8x128xf32>
    tpu.vector_store %arg3[%c0_4, %c128], %10 {strides = array<i32>} : memref<8x256xf32, #tpu.memory_space<vmem>>, vector<8x128xf32>,
    return
  }
  func.func @transform_0(%arg0: i32) -> (i32, i32) {
    %c0_i32 = arith.constant 0 : i32
    %c0_i32_0 = arith.constant 0 : i32
    %c0_i32_1 = arith.constant 0 : i32
    return %c0_i32, %c0_i32_0 : i32, i32
  }
  func.func @transform_1(%arg0: i32) -> (i32, i32) {
    %c0_i32 = arith.constant 0 : i32
    %c0_i32_0 = arith.constant 0 : i32
    %c0_i32_1 = arith.constant 0 : i32
    return %c0_i32, %c0_i32_0 : i32, i32
  }
  func.func @transform_2(%arg0: i32) -> (i32, i32) {
    %c0_i32 = arith.constant 0 : i32
    %c0_i32_0 = arith.constant 0 : i32
    return %arg0, %c0_i32 : i32, i32
  }
}

</mosaic_0001>

<bundles_post_ra>
// kernel: tpu_custom_call.1
= control target key start
LH: loop header
LB: loop body
LE: loop exit
PB: predicated region body
PF: predicated region fallthrough
CT: control target
= control target key end

     0   :  { %v394_v1 = vmov 0   ;;  %s487_s0 = inlined_call_operand.vmem [shape: f32[8,1], index: 0, kind: input, shape index: {}]   ;;  %s488_s1 = inlined_call_operand.vmem [shape: f32[1,128], index: 1, kind: input, shape index: {}]   ;;  %s489_s2 = inlined_call_operand.hbm [shape: f32[8,256], index: 2, kind: output, shape index: {}]  }
   0x1   :  { %v14_v0 = vld [vmem:[%s487_s0] sm:$0xff]  ;;  %366 = vset.pattern.permute.xlu0 %v394_v1 }
   0x2   :  { %18 = vperm.xlu0 %366, %v14_v0  }
   0x3   :  { %7 = vsyncpa [#allocation3], 0  ;;  %v367_v2 = vld [vmem:[%s488_s1] ss:$0 sm:$0xff]  ;;  %v395_v16 = vmov 683565275  }
   0x4   :  { %v396_v18 = vmov 2475754826   ;;  %v397_v21 = vmov 2131351028   ;;  %v398_v24 = vmov 2102212464  }
   0x5   :  { %v399_v27 = vmov 920167782   ;;  %v400_v30 = vmov 1326507024   ;;  %s401_s0 = smov [#allocation2]   ;;  %s343_s15 = sshll.u32 %s489_s2, 4  ;;  %s344_s15 = int_to_ptr.hbm [resolvable:$true] %s343_s15 }
   0x6   :  { %s341_s1 = sshll.u32 %s401_s0, 4  ;;  %s342_s1 = int_to_ptr.vmem [resolvable:$true] %s341_s1 }
  0x74   :  { %v19_v3 = vpop.permute.xlu0 %18 }
  0x75   :  { %v424_v4 = vmul.f32 %v367_v2, %v19_v3 }
  0x77   :  { %v28_v5 = vand.u32 2139095040, %v424_v4  ;;  %v25_v8 = vand.u32 2147483647, %v424_v4  ;;  %vm27_vm12 = vcmp.lt.s32.totalorder %v424_v4, 0 }
  0x79   :  { %v29_v6 = vshrl.u32 %v28_v5, 23  ;;  %v32_v10 = vand.u32 8388607, %v25_v8  ;;  %vm26_vm13 = vcmp.le.f32.partialorder %v25_v8, 0.7853982 }
  0x7b   :  { %v352_v7 = vadd.s32 4294967169, %v29_v6  ;;  %v33_v14 = vor.u32 8388608, %v32_v10 }
  0x7d   :  { %v35_v9 = vadd.s32 1, %v352_v7  ;;  %v441_v37 = vshll.u32 %v33_v14, 8 }
  0x7f   :  { %vm36_vm0 = vcmp.gt.s32.totalorder %v35_v9, 0  ;;  %v74_v46 = vand.u32 65535, %v441_v37  ;;  %v75_v47 = vshrl.u32 %v441_v37, 16 }
  0x80   :  { %v37_v11 = vsel %vm36_vm0, %v35_v9, 0 }
  0x81   :  { %v39_v12 = vand.u32 31, %v37_v11  ;;  %v432_v15 = vshrl.u32 %v37_v11, 5 }
  0x83   :  { %v430_v13 = vsub.s32 32, %v39_v12  ;;  %v42_v17 = vshll.u32 %v395_v16, %v39_v12  ;;  %v45_v19 = vshll.u32 %v396_v18, %v39_v12  ;;  %v48_v23 = vshll.u32 %v397_v21, %v39_v12 }
  0x84   :  { %v51_v26 = vshll.u32 %v398_v24, %v39_v12  ;;  %v54_v29 = vshll.u32 %v399_v27, %v39_v12  ;;  %vm57_vm1 = vcmp.lt.s32.totalorder %v432_v15, 1  ;;  %vm60_vm2 = vcmp.lt.s32.totalorder %v432_v15, 4 }
  0x85   :  { %v43_v20 = vshrl.u32 %v396_v18, %v430_v13  ;;  %v46_v22 = vshrl.u32 %v397_v21, %v430_v13  ;;  %v49_v25 = vshrl.u32 %v398_v24, %v430_v13  ;;  %v52_v28 = vshrl.u32 %v399_v27, %v430_v13 }
  0x86   :  { %v55_v31 = vshrl.u32 %v400_v30, %v430_v13  ;;  %vm59_vm3 = vcmp.lt.s32.totalorder %v432_v15, 3  ;;  %vm58_vm4 = vcmp.lt.s32.totalorder %v432_v15, 2  ;;  %v41_v11 = vshrl.u32 %v395_v16, %v430_v13 }
  0x87   :  { %v44_v32 = vor.u32 %v43_v20, %v42_v17  ;;  %v47_v33 = vor.u32 %v46_v22, %v45_v19  ;;  %v50_v34 = vor.u32 %v49_v25, %v48_v23  ;;  %v53_v35 = vor.u32 %v52_v28, %v51_v26 }
  0x88   :  { %v56_v36 = vor.u32 %v55_v31, %v54_v29 }
  0x89   :  { %v65_v38 = vsel %vm57_vm1, %v44_v32, %v47_v33  ;;  %v69_v39 = vsel %vm57_vm1, %v47_v33, %v50_v34  ;;  %v66_v40 = vsel %vm60_vm2, %v53_v35, 920167782  ;;  %v62_v7 = vsel %vm60_vm2, %v50_v34, 2102212464 }
  0x8a   :  { %v70_v41 = vsel %vm60_vm2, %v56_v36, 1326507024  ;;  %v67_v42 = vsel %vm59_vm3, %v50_v34, %v66_v40  ;;  %v61_v20 = vsel %vm57_vm1, %v41_v11, %v44_v32  ;;  %v63_v21 = vsel %vm59_vm3, %v47_v33, %v62_v7 }
  0x8b   :  { %v71_v43 = vsel %vm59_vm3, %v53_v35, %v70_v41  ;;  %v68_v44 = vsel %vm58_vm4, %v65_v38, %v67_v42  ;;  %v64_v13 = vsel %vm58_vm4, %v61_v20, %v63_v21 }
  0x8c   :  { %v72_v45 = vsel %vm58_vm4, %v69_v39, %v71_v43  ;;  %v98_v50 = vand.u32 65535, %v68_v44  ;;  %v99_v51 = vshrl.u32 %v68_v44, 16  ;;  %v118_v28 = vmul.u32 %v441_v37, %v64_v13 }
  0x8d   :  { %v76_v48 = vand.u32 65535, %v72_v45  ;;  %v77_v49 = vshrl.u32 %v72_v45, 16  ;;  %vm168_vm4 = vweird.f32 %v424_v4 }
  0x8e   :  { %v101_v54 = vmul.u32 %v99_v51, %v74_v46  ;;  %v102_v55 = vmul.u32 %v98_v50, %v75_v47  ;;  %v100_v59 = vmul.u32 %v98_v50, %v74_v46  ;;  %v103_v63 = vmul.u32 %v99_v51, %v75_v47 }
  0x8f   :  { %v79_v52 = vmul.u32 %v77_v49, %v74_v46  ;;  %v80_v53 = vmul.u32 %v76_v48, %v75_v47  ;;  %v78_v56 = vmul.u32 %v76_v48, %v74_v46  ;;  %v81_v58 = vmul.u32 %v77_v49, %v75_v47 }
  0x90   :  { %v104_v60 = vshll.u32 %v101_v54, 16  ;;  %v106_v2 = vshll.u32 %v102_v55, 16  ;;  %v105_v18 = vshrl.u32 %v101_v54, 16  ;;  %v107_v24 = vshrl.u32 %v102_v55, 16 }
  0x91   :  { %v82_v57 = vshll.u32 %v79_v52, 16  ;;  %v84_v61 = vshll.u32 %v80_v53, 16  ;;  %v83_v12 = vshrl.u32 %v79_v52, 16  ;;  %v85_v22 = vshrl.u32 %v80_v53, 16 }
  0x92   :  { %vm108_vm6 = vc.u32 %v100_v59, %v104_v60  ;;  %v110_v3 = vadd.s32 %v104_v60, %v100_v59 }
  0x93   :  { %vm86_vm5 = vc.u32 %v78_v56, %v82_v57  ;;  %v88_v62 = vadd.s32 %v82_v57, %v78_v56  ;;  %v109_v6 = vsel %vm108_vm6, 1, %v394_v1 }
  0x94   :  { %v87_v0 = vsel %vm86_vm5, 1, %v394_v1  ;;  %v111_v10 = vadd.s32 %v109_v6, %v103_v63  ;;  %vm112_vm8 = vc.u32 %v110_v3, %v106_v2  ;;  %v114_v27 = vadd.s32 %v110_v3, %v106_v2 }
  0x95   :  { %v89_v5 = vadd.s32 %v87_v0, %v81_v58  ;;  %vm90_vm7 = vc.u32 %v88_v62, %v84_v61  ;;  %v113_v17 = vsel %vm112_vm8, 1, %v394_v1 }
  0x96   :  { %v91_v9 = vsel %vm90_vm7, 1, %v394_v1  ;;  %v115_v19 = vadd.s32 %v113_v17, %v111_v10 }
  0x97   :  { %v93_v14 = vadd.s32 %v91_v9, %v89_v5 }
  0x98   :  { %v116_v25 = vadd.s32 %v115_v19, %v105_v18 }
  0x99   :  { %v94_v23 = vadd.s32 %v93_v14, %v83_v12 }
  0x9a   :  { %v117_v16 = vadd.s32 %v116_v25, %v107_v24 }
  0x9b   :  { %v95_v26 = vadd.s32 %v94_v23, %v85_v22 }
  0x9c   :  { %v121_v1 = vadd.s32 1, %v117_v16 }
  0x9d   :  { %vm120_vm9 = vc.u32 %v95_v26, %v114_v27  ;;  %v119_v15 = vadd.s32 %v114_v27, %v95_v26 }
  0x9e   :  { %v122_v29 = vsel %vm120_vm9, %v121_v1, %v117_v16 }
  0x9f   :  { %v123_v30 = vadd.s32 %v122_v29, %v118_v28 }
  0xa1   :  { %v124_v31 = vadd.s32 536870912, %v123_v30 }
  0xa3   :  { %v125_v32 = vshrl.u32 %v124_v31, 30 }
  0xa5   :  { %v126_v34 = vshll.u32 %v125_v32, 30  ;;  %v149_v53 = vsub.s32 4, %v125_v32 }
  0xa7   :  { %v127_v33 = vsub.s32 %v123_v30, %v126_v34  ;;  %v150_v58 = vsel %vm27_vm12, %v149_v53, %v125_v32 }
  0xa8   :  { %v152_v61 = vsel %vm26_vm13, 0, %v150_v58 }
  0xa9   :  { %vm128_vm10 = vcmp.lt.s32.totalorder %v127_v33, 0  ;;  %v129_v35 = vsub.s32 0, %v127_v33  ;;  %v324_v3 = vadd.s32 3, %v152_v61  ;;  %v169_v9 = vand.u32 3, %v152_v61 }
  0xab   :  { %v130_v36 = vsel %vm128_vm10, %v129_v35, %v127_v33  ;;  %v325_v10 = vand.u32 3, %v324_v3  ;;  %vm170_vm14 = vcmp.lt.s32.totalorder %v169_v9, 2  ;;  %vm171_vm15 = vcmp.eq.s32.totalorder %v169_v9, 0 }
  0xac   :  { %v131_v38 = vclz %v130_v36  ;;  %vm174_vm0 = vcmp.eq.s32.totalorder %v169_v9, 2 }
  0xad   :  { %vm326_vm1 = vcmp.lt.s32.totalorder %v325_v10, 2  ;;  %vm327_vm2 = vcmp.eq.s32.totalorder %v325_v10, 0  ;;  %vm330_vm3 = vcmp.eq.s32.totalorder %v325_v10, 2 }
  0xae   :  { %v353_v39 = vadd.s32 4294967294, %v131_v38 }
  0xb0   :  { %vm354_vm11 = vcmp.lt.s32.totalorder %v353_v39, 0 }
  0xb1   :  { %v134_v40 = vsel %vm354_vm11, 0, %v353_v39 }
  0xb2   :  { %v135_v41 = vsub.s32 32, %v134_v40  ;;  %v139_v42 = vsub.s32 4294967266, %v134_v40  ;;  %v136_v43 = vshll.u32 %v127_v33, %v134_v40 }
  0xb4   :  { %v137_v44 = vshrl.u32 %v119_v15, %v135_v41  ;;  %v140_v45 = vadd.s32 127, %v139_v42 }
  0xb6   :  { %v138_v37 = vor.u32 %v137_v44, %v136_v43  ;;  %v141_v46 = vshll.u32 %v140_v45, 23 }
  0xb8   :  { %v142_v47 = vor.u32 4788187, %v141_v46  ;;  %v145_v49 = vcvt.s32.f32 %v138_v37 }
  0xba   :  { %v143_v48 = vand.u32 2147483647, %v142_v47 }
  0xbc   :  { %v146_v50 = vmul.f32 %v145_v49, %v143_v48 }
  0xbe   :  { %v147_v51 = vxor.u32 2147483648, %v146_v50 }
  0xc0   :  { %v148_v52 = vsel %vm27_vm12, %v147_v51, %v146_v50 }
  0xc1   :  { %v151_v54 = vsel %vm26_vm13, %v424_v4, %v148_v52 }
  0xc2   :  { %v153_v55 = vmul.f32 %v151_v54, %v151_v54 }
  0xc4   :  { %v154_v56 = vmul.f32 -0.001358992, %v153_v55  ;;  %v161_v57 = vmul.f32 -0.00019511016, %v153_v55 }
  0xc6   :  { %v155_v59 = vadd.f32 0.041655596, %v154_v56  ;;  %v162_v60 = vadd.f32 0.008332121, %v161_v57 }
  0xc8   :  { %v156_v62 = vmul.f32 %v155_v59, %v153_v55  ;;  %v163_v63 = vmul.f32 %v162_v60, %v153_v55 }
  0xca   :  { %v157_v0 = vadd.f32 -0.4999988, %v156_v62  ;;  %v164_v2 = vadd.f32 -0.16666654, %v163_v63 }
  0xcc   :  { %v158_v5 = vmul.f32 %v157_v0, %v153_v55  ;;  %v165_v6 = vmul.f32 %v164_v2, %v153_v55 }
  0xce   :  { %v159_v7 = vadd.f32 1.0, %v158_v5  ;;  %v166_v8 = vadd.f32 1.0, %v165_v6 }
  0xd0   :  { %v167_v11 = vmul.f32 %v166_v8, %v151_v54  ;;  %v175_v12 = vxor.u32 2147483648, %v159_v7 }
  0xd2   :  { %v172_v14 = vxor.u32 2147483648, %v167_v11  ;;  %v176_v18 = vsel %vm174_vm0, %v175_v12, %v167_v11  ;;  %v332_v20 = vsel %vm330_vm3, %v175_v12, %v167_v11 }
  0xd4   :  { %v173_v17 = vsel %vm171_vm15, %v159_v7, %v172_v14  ;;  %v329_v19 = vsel %vm327_vm2, %v159_v7, %v172_v14 }
  0xd5   :  { %v177_v21 = vsel %vm170_vm14, %v173_v17, %v176_v18  ;;  %v333_v22 = vsel %vm326_vm1, %v329_v19, %v332_v20 }
  0xd6   :  { %v178_v23 = vsel %vm168_vm4, nan, %v177_v21  ;;  %v334_v24 = vsel %vm168_vm4, nan, %v333_v22 }
  0xd7   :  { %179 = vst [vmem:[#allocation2] sm:$0xff] %v178_v23 }
  0xd8   :  { %335 = vst [vmem:[#allocation2 + $0x8] sm:$0xff] %v334_v24 }
  0xd9   :  { %346 = dma.vmem_to_hbm [thread:$0]  %s342_s1, 256, %s344_s15, [#allocation3]  }
  0xda   :  { %392 = dma.done.wait [#allocation3], 256  }
  0xdb   :  { %393 = vsyncadd [#allocation3], 4294967040 }
  0xdc   :  { %351 = vsyncpa [#allocation3], 1 }

</bundles_post_ra>
